<compile_context>
chip_gen: v5e
topology: v5e:2x2
jax: 0.10.0
libtpu: 0.0.40
codegen_flags: <defaults>
</compile_context>

<pallas_src>
import functools

import jax
import jax.numpy as jnp
import numpy as np
from jax import lax
from jax.experimental import pallas as pl
from jax.experimental.pallas import tpu as pltpu


# --------------------------------------------------------------------------
# Kernels
# --------------------------------------------------------------------------
def iln_stats_kernel(x_ref, sum_ref, sq_ref, *, hw, tile, ragged):
    """Accumulate per-(b, c) sum and sum-of-squares across H*W tiles.

    The trailing partial tile (when HW % tile != 0) is masked so the
    unspecified padding Pallas reads never enters the sums.
    """
    t = pl.program_id(1)

    @pl.when(t == 0)
    def _init():
        sum_ref[...] = jnp.zeros_like(sum_ref)
        sq_ref[...] = jnp.zeros_like(sq_ref)

    x = x_ref[...].astype(jnp.float32)                        # (1, C, tile)
    if ragged:
        lane = lax.broadcasted_iota(jnp.int32, x.shape, dimension=2)
        valid = (t * tile + lane) < hw
        x = jnp.where(valid, x, 0.0)
    sum_ref[...] += jnp.sum(x, axis=-1, keepdims=True)        # (1, C, 1)
    sq_ref[...] += jnp.sum(x * x, axis=-1, keepdims=True)     # (1, C, 1)


def iln_apply_kernel(x_ref, scale_ref, bias_ref, o_ref):
    """Pure fused multiply-add: out = x * scale + bias (per-channel)."""
    x = x_ref[...].astype(jnp.float32)                        # (1, C, T)
    o_ref[...] = (x * scale_ref[...] + bias_ref[...]).astype(o_ref.dtype)


def iln_fused_kernel(x_ref, a0_ref, a1_ref, beta_ref, o_ref, *, eps, hw, num_ch):
    """Single pass over one (1, C, HW) batch slab resident in VMEM:
    stats + scale/bias fold + FMA, so x is read from HBM exactly once."""
    x = x_ref[...].astype(jnp.float32)                        # (1, C, HW)

    s = jnp.sum(x, axis=-1, keepdims=True)                    # (1, C, 1)
    sq = jnp.sum(x * x, axis=-1, keepdims=True)               # (1, C, 1)

    # Instance-norm stats (per-channel; unbiased variance, E[x^2] - mean^2).
    n_in = float(hw)
    in_mean = s * (1.0 / n_in)
    in_var = jnp.maximum(sq - s * in_mean, 0.0) * (1.0 / (n_in - 1.0))
    in_inv = lax.rsqrt(in_var + eps)                          # (1, C, 1)

    # Layer-norm stats (per-sample) from the per-channel sums (tiny C-combine).
    n_ln = float(num_ch * hw)
    ls = jnp.sum(s, axis=1, keepdims=True)                    # (1, 1, 1)
    lsq = jnp.sum(sq, axis=1, keepdims=True)                  # (1, 1, 1)
    ln_mean = ls * (1.0 / n_ln)
    ln_var = jnp.maximum(lsq - ls * ln_mean, 0.0) * (1.0 / (n_ln - 1.0))
    ln_inv = lax.rsqrt(ln_var + eps)                          # (1, 1, 1)

    a0 = a0_ref[...]                                          # gamma * rho0
    a1 = a1_ref[...]                                          # gamma * rho1
    beta = beta_ref[...]

    # out = x*scale + bias  ==  rho0*g*IN(x) + rho1*g*LN(x) + beta
    scale = a0 * in_inv + a1 * ln_inv                         # (1, C, 1)
    bias = beta - (a0 * (in_mean * in_inv) + a1 * (ln_mean * ln_inv))
    o_ref[...] = (x * scale + bias).astype(o_ref.dtype)


# --------------------------------------------------------------------------
# Wrapper
# --------------------------------------------------------------------------
def _vmem_capacity_bytes():
    try:
        return int(pltpu.get_tpu_info().vmem_capacity_bytes)
    except Exception:
        return 128 * 1024 * 1024


def iln_forward(x, rho, gamma, beta, eps=1e-5, force_two_pass=False):
    """x: (B, C, H, W); rho: (1, C, 2); gamma, beta: (1, C, 1, 1)."""
    B, C, H, W = x.shape
    HW = H * W
    LANE = 128

    vmem_cap = _vmem_capacity_bytes()
    small_vmem = vmem_cap <= 64 * 1024 * 1024    # v7x-class: half the VMEM

    x3 = x.reshape(B, C, HW)                     # lane-dense layout, no pad

    # Tiny parameter glue (O(C)): softmax over rho mixing logits, fold gamma.
    rho_sm = jax.nn.softmax(rho.astype(jnp.float32), axis=2)    # (1, C, 2)
    g = gamma.reshape(1, C, 1).astype(jnp.float32)
    a0 = g * rho_sm[:, :, 0].reshape(1, C, 1)
    a1 = g * rho_sm[:, :, 1].reshape(1, C, 1)
    beta_p = beta.reshape(1, C, 1).astype(jnp.float32)

    param_spec = pl.BlockSpec((1, C, 1), lambda b, *_: (0, 0, 0))

    # ---------------- Fused single-pass path ----------------
    slab_f32_bytes = C * HW * 4
    fused_budget = (6 if small_vmem else 12) * 1024 * 1024
    use_fused = (not force_two_pass) and (slab_f32_bytes <= fused_budget)

    if use_fused:
        slab_spec = pl.BlockSpec((1, C, HW), lambda b: (b, 0, 0))
        fused_vmem_limit = min((vmem_cap * 3) // 4, 96 * 1024 * 1024)
        kernel = functools.partial(iln_fused_kernel,
                                   eps=float(eps), hw=HW, num_ch=C)
        out3 = pl.pallas_call(
            kernel,
            out_shape=jax.ShapeDtypeStruct((B, C, HW), x.dtype),
            grid=(B,),
            in_specs=[slab_spec, param_spec, param_spec, param_spec],
            out_specs=slab_spec,
            compiler_params=pltpu.CompilerParams(
                dimension_semantics=("parallel",),
                vmem_limit_bytes=fused_vmem_limit),
        )(x3, a0, a1, beta_p)
        return out3.reshape(B, C, H, W)

    # ---------------- Two-pass fallback path ----------------
    # Lane-aligned HW tile, f32-slab capped at ~4 MiB (big enough to amortize
    # per-step overhead, small enough for a 32 MiB scoped-VMEM limit on v7x).
    tile_bytes_cap = 4 * 1024 * 1024
    max_t = max(LANE, ((tile_bytes_cap // (4 * C)) // LANE) * LANE)
    hw_lanes = pl.cdiv(HW, LANE) * LANE
    tile = min(hw_lanes, max_t)
    n_t = pl.cdiv(HW, tile)
    ragged = (HW % tile) != 0
    two_pass_vmem_limit = 32 * 1024 * 1024

    x_spec = pl.BlockSpec((1, C, tile), lambda b, t: (b, 0, t))
    stat_spec = pl.BlockSpec((1, C, 1), lambda b, t: (b, 0, 0))

    # --- Pass 1: per-(b, c) sum and sum of squares over H*W (tail masked). ---
    stats_kernel = functools.partial(iln_stats_kernel,
                                     hw=HW, tile=tile, ragged=ragged)
    s_sum, s_sq = pl.pallas_call(
        stats_kernel,
        out_shape=(jax.ShapeDtypeStruct((B, C, 1), jnp.float32),
                   jax.ShapeDtypeStruct((B, C, 1), jnp.float32)),
        grid=(B, n_t),
        in_specs=[x_spec],
        out_specs=(stat_spec, stat_spec),
        compiler_params=pltpu.CompilerParams(
            dimension_semantics=("parallel", "arbitrary"),
            vmem_limit_bytes=two_pass_vmem_limit),
    )(x3)

    # Fold IN/LN stats + params into per-(b, c) scale & bias (O(B*C), wrapper).
    n_in = float(HW)
    in_mean = s_sum * (1.0 / n_in)                               # (B, C, 1)
    in_var = jnp.maximum(s_sq - s_sum * in_mean, 0.0) * (1.0 / (n_in - 1.0))
    in_inv = lax.rsqrt(in_var + eps)

    n_ln = float(C * HW)
    ls = jnp.sum(s_sum, axis=1, keepdims=True)                   # (B, 1, 1)
    lsq = jnp.sum(s_sq, axis=1, keepdims=True)
    ln_mean = ls * (1.0 / n_ln)
    ln_var = jnp.maximum(lsq - ls * ln_mean, 0.0) * (1.0 / (n_ln - 1.0))
    ln_inv = lax.rsqrt(ln_var + eps)

    scale = a0 * in_inv + a1 * ln_inv                            # (B, C, 1)
    bias = beta_p - (a0 * (in_mean * in_inv) + a1 * (ln_mean * ln_inv))

    # --- Pass 2: pure x*scale+bias FMA (both grid axes parallel). ---
    sb_spec = pl.BlockSpec((1, C, 1), lambda b, t: (b, 0, 0))
    out3 = pl.pallas_call(
        iln_apply_kernel,
        out_shape=jax.ShapeDtypeStruct((B, C, HW), x.dtype),
        grid=(B, n_t),
        in_specs=[x_spec, sb_spec, sb_spec],
        out_specs=x_spec,
        compiler_params=pltpu.CompilerParams(
            dimension_semantics=("parallel", "parallel"),
            vmem_limit_bytes=two_pass_vmem_limit),
    )(x3, scale, bias)

    return out3.reshape(B, C, H, W)


# --------------------------------------------------------------------------
# Pure-JAX reference (replica of the PyTorch forward, using_bn=False)
# --------------------------------------------------------------------------
def iln_reference(x, rho, gamma, beta, eps=1e-5):
    x = x.astype(jnp.float32)
    B, C, H, W = x.shape
    in_mean = jnp.mean(x, axis=(2, 3), keepdims=True)
    in_var = jnp.var(x, axis=(2, 3), keepdims=True, ddof=1)
    out_in = (x - in_mean) / jnp.sqrt(in_var + eps)
    ln_mean = jnp.mean(x, axis=(1, 2, 3), keepdims=True)
    ln_var = jnp.var(x, axis=(1, 2, 3), keepdims=True, ddof=1)
    out_ln = (x - ln_mean) / jnp.sqrt(ln_var + eps)
    rho_sm = jax.nn.softmax(rho, axis=2)
    rho0 = rho_sm[:, :, 0].reshape(1, C, 1, 1)
    rho1 = rho_sm[:, :, 1].reshape(1, C, 1, 1)
    out = rho0 * out_in + rho1 * out_ln
    return out * gamma + beta


if __name__ == "__main__":
    # Deterministic parameter init matching ILN.__init__ (using_bn=False):
    #   rho[:, :, 0] = 1.0, rho[:, :, 1] = 3.2, gamma = 1.0, beta = 0.0
    def make_params(C):
        rho = jnp.concatenate(
            [jnp.full((1, C, 1), 1.0, jnp.float32),
             jnp.full((1, C, 1), 3.2, jnp.float32)], axis=2)
        gamma = jnp.ones((1, C, 1, 1), jnp.float32)
        beta = jnp.zeros((1, C, 1, 1), jnp.float32)
        return rho, gamma, beta

    key = jax.random.PRNGKey(0)
    k1, k2 = jax.random.split(key)

    # Case 1: small module-consistent shape -> fused single-pass path.
    B, C, H, W = 2, 4, 16, 16
    rho, gamma, beta = make_params(C)
    x = jax.random.normal(k1, (B, C, H, W), dtype=jnp.float32)
    out = jax.block_until_ready(iln_forward(x, rho, gamma, beta, eps=1e-5))
    ref = jax.block_until_ready(iln_reference(x, rho, gamma, beta, eps=1e-5))
    np.testing.assert_allclose(np.asarray(out), np.asarray(ref),
                               rtol=1e-5, atol=1e-5)

    # Case 2: ragged HW (H*W % 128 != 0) forced through the two-pass path,
    # exercising in-kernel tail masking and partial-block stores.
    B2, C2, H2, W2 = 2, 8, 9, 15
    rho2, gamma2, beta2 = make_params(C2)
    x2 = jax.random.normal(k2, (B2, C2, H2, W2), dtype=jnp.float32)
    out2 = jax.block_until_ready(
        iln_forward(x2, rho2, gamma2, beta2, eps=1e-5, force_two_pass=True))
    ref2 = jax.block_until_ready(
        iln_reference(x2, rho2, gamma2, beta2, eps=1e-5))
    np.testing.assert_allclose(np.asarray(out2), np.asarray(ref2),
                               rtol=1e-5, atol=1e-5)

    print("KERNEL_OK")
</pallas_src>

<mosaic_0001>
module attributes {stable_mosaic.version = 11 : i64} {
  func.func @iln_fused_kernel(%arg0: i32, %arg1: memref<1x4x256xf32, #tpu.memory_space<vmem>>, %arg2: memref<1x4x1xf32, #tpu.memory_space<vmem>>, %arg3: memref<1x4x1xf32, #tpu.memory_space<vmem>>, %arg4: memref<1x4x1xf32, #tpu.memory_space<vmem>>, %arg5: memref<1x4x256xf32, #tpu.memory_space<vmem>>) attributes {dimension_semantics = [#tpu.dimension_semantics<parallel>], iteration_bounds = array<i64: 2>, scalar_prefetch = 0 : i64, scratch_operands = 0 : i64, tpu.core_type = #tpu.core_type<tc>, window_params = [{transform_indices = @transform_0, window_bounds = array<i64: 1, 4, 256>}, {pipeline_mode = #tpu.pipeline_mode<synchronous>, transform_indices = @transform_1, window_bounds = array<i64: 1, 4, 1>}, {pipeline_mode = #tpu.pipeline_mode<synchronous>, transform_indices = @transform_2, window_bounds = array<i64: 1, 4, 1>}, {pipeline_mode = #tpu.pipeline_mode<synchronous>, transform_indices = @transform_3, window_bounds = array<i64: 1, 4, 1>}, {transform_indices = @transform_4, window_bounds = array<i64: 1, 4, 256>}]} {
    %c0 = arith.constant 0 : index
    %c0_0 = arith.constant 0 : index
    %c0_1 = arith.constant 0 : index
    %0 = vector.load %arg1[%c0, %c0_0, %c0_1] : memref<1x4x256xf32, #tpu.memory_space<vmem>>, vector<1x4x256xf32>
    %cst = arith.constant dense<0.000000e+00> : vector<1x4xf32>
    %1 = vector.multi_reduction <add>, %0, %cst [2] : vector<1x4x256xf32> to vector<1x4xf32>
    %2 = vector.shape_cast %1 : vector<1x4xf32> to vector<1x4x1xf32>
    %3 = arith.mulf %0, %0 : vector<1x4x256xf32>
    %cst_2 = arith.constant dense<0.000000e+00> : vector<1x4xf32>
    %4 = vector.multi_reduction <add>, %3, %cst_2 [2] : vector<1x4x256xf32> to vector<1x4xf32>
    %5 = vector.shape_cast %4 : vector<1x4xf32> to vector<1x4x1xf32>
    %cst_3 = arith.constant 3.906250e-03 : f32
    %6 = vector.broadcast %cst_3 : f32 to vector<1x4x1xf32>
    %7 = arith.mulf %2, %6 : vector<1x4x1xf32>
    %8 = arith.mulf %2, %7 : vector<1x4x1xf32>
    %9 = arith.subf %5, %8 : vector<1x4x1xf32>
    %cst_4 = arith.constant 0.000000e+00 : f32
    %10 = vector.broadcast %cst_4 : f32 to vector<1x4x1xf32>
    %11 = arith.maximumf %9, %10 : vector<1x4x1xf32>
    %cst_5 = arith.constant 0.00392156886 : f32
    %12 = vector.broadcast %cst_5 : f32 to vector<1x4x1xf32>
    %13 = arith.mulf %11, %12 : vector<1x4x1xf32>
    %cst_6 = arith.constant 9.99999974E-6 : f32
    %14 = vector.broadcast %cst_6 : f32 to vector<1x4x1xf32>
    %15 = arith.addf %13, %14 : vector<1x4x1xf32>
    %16 = math.rsqrt %15 : vector<1x4x1xf32>
    %cst_7 = arith.constant dense<0.000000e+00> : vector<1x1xf32>
    %17 = vector.multi_reduction <add>, %2, %cst_7 [1] : vector<1x4x1xf32> to vector<1x1xf32>
    %18 = vector.shape_cast %17 : vector<1x1xf32> to vector<1x1x1xf32>
    %cst_8 = arith.constant dense<0.000000e+00> : vector<1x1xf32>
    %19 = vector.multi_reduction <add>, %5, %cst_8 [1] : vector<1x4x1xf32> to vector<1x1xf32>
    %20 = vector.shape_cast %19 : vector<1x1xf32> to vector<1x1x1xf32>
    %cst_9 = arith.constant 9.765625E-4 : f32
    %21 = vector.broadcast %cst_9 : f32 to vector<1x1x1xf32>
    %22 = arith.mulf %18, %21 : vector<1x1x1xf32>
    %23 = arith.mulf %18, %22 : vector<1x1x1xf32>
    %24 = arith.subf %20, %23 : vector<1x1x1xf32>
    %cst_10 = arith.constant 0.000000e+00 : f32
    %25 = vector.broadcast %cst_10 : f32 to vector<1x1x1xf32>
    %26 = arith.maximumf %24, %25 : vector<1x1x1xf32>
    %cst_11 = arith.constant 9.77517105E-4 : f32
    %27 = vector.broadcast %cst_11 : f32 to vector<1x1x1xf32>
    %28 = arith.mulf %26, %27 : vector<1x1x1xf32>
    %cst_12 = arith.constant 9.99999974E-6 : f32
    %29 = vector.broadcast %cst_12 : f32 to vector<1x1x1xf32>
    %30 = arith.addf %28, %29 : vector<1x1x1xf32>
    %31 = math.rsqrt %30 : vector<1x1x1xf32>
    %c0_13 = arith.constant 0 : index
    %c0_14 = arith.constant 0 : index
    %c0_15 = arith.constant 0 : index
    %32 = vector.load %arg2[%c0_13, %c0_14, %c0_15] : memref<1x4x1xf32, #tpu.memory_space<vmem>>, vector<1x4x1xf32>
    %c0_16 = arith.constant 0 : index
    %c0_17 = arith.constant 0 : index
    %c0_18 = arith.constant 0 : index
    %33 = vector.load %arg3[%c0_16, %c0_17, %c0_18] : memref<1x4x1xf32, #tpu.memory_space<vmem>>, vector<1x4x1xf32>
    %c0_19 = arith.constant 0 : index
    %c0_20 = arith.constant 0 : index
    %c0_21 = arith.constant 0 : index
    %34 = vector.load %arg4[%c0_19, %c0_20, %c0_21] : memref<1x4x1xf32, #tpu.memory_space<vmem>>, vector<1x4x1xf32>
    %35 = arith.mulf %32, %16 : vector<1x4x1xf32>
    %36 = vector.broadcast %31 : vector<1x1x1xf32> to vector<1x4x1xf32>
    %37 = arith.mulf %33, %36 : vector<1x4x1xf32>
    %38 = arith.addf %35, %37 : vector<1x4x1xf32>
    %39 = arith.mulf %7, %16 : vector<1x4x1xf32>
    %40 = arith.mulf %32, %39 : vector<1x4x1xf32>
    %41 = arith.mulf %22, %31 : vector<1x1x1xf32>
    %42 = vector.broadcast %41 : vector<1x1x1xf32> to vector<1x4x1xf32>
    %43 = arith.mulf %33, %42 : vector<1x4x1xf32>
    %44 = arith.addf %40, %43 : vector<1x4x1xf32>
    %45 = arith.subf %34, %44 : vector<1x4x1xf32>
    %46 = vector.broadcast %38 : vector<1x4x1xf32> to vector<1x4x256xf32>
    %47 = arith.mulf %0, %46 : vector<1x4x256xf32>
    %48 = vector.broadcast %45 : vector<1x4x1xf32> to vector<1x4x256xf32>
    %49 = arith.addf %47, %48 : vector<1x4x256xf32>
    %c0_22 = arith.constant 0 : index
    %c0_23 = arith.constant 0 : index
    %c0_24 = arith.constant 0 : index
    %50 = vector.load %arg5[%c0_22, %c0_23, %c0_24] : memref<1x4x256xf32, #tpu.memory_space<vmem>>, vector<1x4x256xf32>
    tpu.vector_store %arg5[%c0_22, %c0_23, %c0_24], %49 {strides = array<i32>} : memref<1x4x256xf32, #tpu.memory_space<vmem>>, vector<1x4x256xf32>,
    return
  }
  func.func @transform_0(%arg0: i32) -> (i32, i32, i32) {
    %c0_i32 = arith.constant 0 : i32
    %c0_i32_0 = arith.constant 0 : i32
    %c0_i32_1 = arith.constant 0 : i32
    return %arg0, %c0_i32, %c0_i32_0 : i32, i32, i32
  }
  func.func @transform_1(%arg0: i32) -> (i32, i32, i32) {
    %c0_i32 = arith.constant 0 : i32
    %c0_i32_0 = arith.constant 0 : i32
    %c0_i32_1 = arith.constant 0 : i32
    %c0_i32_2 = arith.constant 0 : i32
    return %c0_i32, %c0_i32_0, %c0_i32_1 : i32, i32, i32
  }
  func.func @transform_2(%arg0: i32) -> (i32, i32, i32) {
    %c0_i32 = arith.constant 0 : i32
    %c0_i32_0 = arith.constant 0 : i32
    %c0_i32_1 = arith.constant 0 : i32
    %c0_i32_2 = arith.constant 0 : i32
    return %c0_i32, %c0_i32_0, %c0_i32_1 : i32, i32, i32
  }
  func.func @transform_3(%arg0: i32) -> (i32, i32, i32) {
    %c0_i32 = arith.constant 0 : i32
    %c0_i32_0 = arith.constant 0 : i32
    %c0_i32_1 = arith.constant 0 : i32
    %c0_i32_2 = arith.constant 0 : i32
    return %c0_i32, %c0_i32_0, %c0_i32_1 : i32, i32, i32
  }
  func.func @transform_4(%arg0: i32) -> (i32, i32, i32) {
    %c0_i32 = arith.constant 0 : i32
    %c0_i32_0 = arith.constant 0 : i32
    %c0_i32_1 = arith.constant 0 : i32
    return %arg0, %c0_i32, %c0_i32_0 : i32, i32, i32
  }
}

</mosaic_0001>

<bundles_post_ra>
// kernel: tpu_custom_call.1
= control target key start
LH: loop header
LB: loop body
LE: loop exit
PB: predicated region body
PF: predicated region fallthrough
CT: control target
= control target key end

     0   :  { %9 = vsyncpa [#allocation3], 0  ;;  %s754_s0 = inlined_call_operand.hbm [shape: f32[2,4,256], index: 0, kind: input, shape index: {}]   ;;  %s755_s1 = inlined_call_operand.vmem [shape: f32[1,4,1], index: 1, kind: input, shape index: {}]   ;;  %s756_s2 = inlined_call_operand.vmem [shape: f32[1,4,1], index: 2, kind: input, shape index: {}]   ;;  %s757_s3 = inlined_call_operand.vmem [shape: f32[1,4,1], index: 3, kind: input, shape index: {}]   ;;  %s758_s4 = inlined_call_operand.hbm [shape: f32[2,4,256], index: 4, kind: output, shape index: {}]  }
   0x1   :  { %11 = vsyncpa [#allocation3 + $0x1], 0 }
   0x2   :  { %12 = vsyncpa [#allocation4], 0 }
   0x3   :  { %14 = vsyncpa [#allocation4 + $0x1], 0  ;;  %s602_s15 = smov 0   ;;  %s604_s16 = smov 0  }
   0x4   :  { %s606_s17 = smov 0   ;;  %s608_s18 = smov 0  }
   0x5 LB: > { %s623_s19 = sadd.s32 4294967295, %s573_s18   ;;  %s407_s20 = sadd.s32 4294967294, %s573_s18   ;;  %s573_s18 = sphi %s608_s18, %s768_s18   ;;  %s569_s17 = sphi %s606_s17, %s767_s17   ;;  %s565_s16 = sphi %s604_s16, %s766_s16   ;;  %s561_s15 = sphi %s602_s15, %s765_s15  }
   0x6   : > { %s627_s21 = sadd.s32 1, %s573_s18   ;;  %s27_s22 = sadd.s32 1, %s569_s17 }
   0x7   : > { %s24_s23 = ssub.s32 %s573_s18, %s627_s21  ;;  %p34_p0 = scmp.ne.s32.totalorder %s569_s17, %s565_s16 }
   0x8   : > { %p25_p1 = scmp.eq.s32.totalorder %s24_s23, 0  ;;  %p35_p2 = scmp.eq.s32.totalorder %s573_s18, 0 }
   0x9   : > { %p40_p3 = scmp.ne.s32.totalorder %s565_s16, %s561_s15  ;;  %p41_p4 = scmp.eq.s32.totalorder %s623_s19, 0 }
   0xa   : > { %s639_s24 = scalar_select %p25_p1, %s569_s17, %s27_s22  }
   0xb   : > { %p641_p5 = por %p35_p2, %p34_p0  ;;  %p645_p6 = por %p41_p4, %p40_p3 }
   0xc   : > { %p127_p7 = scmp.eq.s32.totalorder %s623_s19, 1  ;;  %p133_p8 = scmp.eq.s32.totalorder %s407_s20, 1 }
   0xd   : > { %p435_p10 = scmp.lt.s32.totalorder %s573_s18, 2  ;;  %s162_s29 = sand.u32 1, %s569_s17  }
   0xe   : > { %p652_p11 = por %p127_p7, %p34_p0  ;;  %p656_p12 = por %p133_p8, %p40_p3 }
   0xf   : > { %s421_s30 = sshll.u32 %s573_s18, 3  ;;  %s410_s5 = sshll.u32 %s162_s29, 3 }
  0x10   : > { %s171_s8 = scalar_lea.hbm %s754_s0, %s421_s30  ;;  %s166_s10 = scalar_lea.vmem [#allocation2], %s410_s5 }
  0x11   : > { %s173_s9 = sshll.u32 %s171_s8, 4  ;;  %s175_s11 = sshll.u32 %s166_s10, 4  ;;  %s174_s9 = int_to_ptr.hbm [resolvable:$true] %s173_s9  ;;  %s176_s11 = int_to_ptr.vmem [resolvable:$true] %s175_s11 }
  0x12   : > { %p667_p13 = pnand %p435_p10, %p641_p5  ;;  %p413_p0 = scmp.ge.s32.totalorder %s573_s18, 1 }
  0x13   : > { %p180_p1 = scmp.lt.s32.totalorder %s573_s18, 3  ;;  %s163_s13 = scalar_lea.sflag [#allocation3], %s162_s29 }
  0x14   : > { %s477_s14 = sshra.s32 %s174_s9, 4  ;;  %p481_p3 = pneg %p667_p13  ;;  %s478_s14 = int_to_ptr.hbm [resolvable:$true] %s477_s14 }
  0x15   : > { %s479_s20 = scalar_lea.hbm %s478_s14, 8  ;;  %s484_s25 = scalar_lea.hbm %s754_s0, 16 }
  0x16   : > { %p480_p2 = scmp.ne.s32.totalorder %s478_s14, %s479_s20  ;;  %p485_p5 = scmp.lt.s32.totalorder %s478_s14, %s754_s0 }
  0x17   : > { %p486_p8 = scmp.lt.s32.totalorder %s484_s25, %s479_s20 }
  0x18   : > { %p482_p4 = pnand %p481_p3, %p480_p2 }
  0x19   : > { %p487_p10 = por %p486_p8, %p485_p5 }
  0x1a   : > { %p483_p7 = pneg %p482_p4 }
  0x1c   : > { %p488_p9 = pnand %p487_p10, %p483_p7 }
  0x1e   : > { %491 = shalt.err (!%p488_p9)
}
  0x1f   : > { %430 = dma.hbm_to_vmem [thread:$0]  (!%p667_p13), %s174_s9, 128, %s176_s11, %s163_s13  }
  0x20   : > { %p181_p2 = pnand %p413_p0, %p180_p1 }
  0x21   : > { %s688_s29 = sand.u32 (!%p181_p2), 1, %s565_s16  }
  0x22   : > { %184 = sbr.rel (%p181_p2) target bundleno = 349 (0x15d), region = 36  ;;  %s414_s6 = sshll.u32 (!%p181_p2), %s688_s29, 3 }
  0x23   : > { %s187_s7 = scalar_lea.sflag (!%p181_p2), [#allocation3], %s688_s29  ;;  %s190_s8 = scalar_lea.vmem (!%p181_p2), [#allocation2], %s414_s6 }
  0x27   : > { %552 = dma.done.wait (%p645_p6), %s187_s7, 128  }
  0x28   : > { %554 = vsyncadd (%p645_p6), %s187_s7, 4294967168  ;;  %v698_v0 = vld [vmem:[%s190_s8] sm:$0xff]  ;;  %vm223_vm0 = vcmask 1043456   ;;  %v575_v18 = vmov 0   ;;  %v287_v54 = vld [vmem:[%s755_s1] sm:$0xf] }
  0x29   : > { %218 = vst [vmem:[#allocation1] ss:$2 sm:$0xff] %v698_v0  ;;  %v229_v1 = vmul.f32 %v698_v0, %v698_v0  ;;  %471 = vset.pattern.permute.xlu1 %v575_v18  ;;  %472 = vset.pattern.permute.xlu0 %v575_v18  ;;  %v288_v55 = vld [vmem:[%s756_s2] sm:$0xf]  ;;  %s422_s14 = sshll.u32 %s623_s19, 3  ;;  %s215_s25 = scalar_lea.vmem [#allocation5], %s414_s6 }
  0x2a   : > { %s332_s23 = scalar_lea.hbm %s758_s4, %s422_s14  ;;  %s334_s30 = sshll.u32 %s215_s25, 4  ;;  %s335_s30 = int_to_ptr.vmem [resolvable:$true] %s334_s30 }
  0x2b   : > { %s336_s5 = sshll.u32 %s332_s23, 4  ;;  %s321_s7 = scalar_lea.sflag [#allocation4], %s688_s29  ;;  %s337_s5 = int_to_ptr.hbm [resolvable:$true] %s336_s5 }
  0x2c   : > { %s521_s19 = sshra.s32 %s337_s5, 4  ;;  %s527_s6 = scalar_lea.hbm %s758_s4, 16  ;;  %s522_s19 = int_to_ptr.hbm [resolvable:$true] %s521_s19 }
  0x2d   : > { %s523_s8 = scalar_lea.hbm %s522_s19, 8  ;;  %p528_p0 = scmp.lt.s32.totalorder %s522_s19, %s758_s4 }
  0x2e   : > { %p524_p6 = scmp.ne.s32.totalorder %s522_s19, %s523_s8  ;;  %p529_p1 = scmp.lt.s32.totalorder %s527_s6, %s523_s8 }
  0x30   : > { %v219_v2 = vld.sshfl [vmem:[#allocation1] sm:$0xff pattern:$0x75316420]  ;;  %v220_v3 = vld.sshfl [vmem:[#allocation1 + $0x8] sm:$0xff pattern:$0x75316420]  ;;  %p525_p9 = pnand %p524_p6, %p652_p11  ;;  %p530_p3 = por %p529_p1, %p528_p0 }
  0x31   : > { %v224_v4 = vsel %vm223_vm0, %v219_v2, 0.0  ;;  %v225_v5 = vsel %vm223_vm0, %v220_v3, 0.0  ;;  %231 = vst [vmem:[#allocation1] ss:$2 sm:$0xff] %v229_v1  ;;  %v289_v2 = vld [vmem:[%s757_s3] sm:$0xf] }
  0x32   : > { %v226_v6 = vadd.f32 %v225_v5, %v224_v4  ;;  %v576_v4 = vmov 839922192   ;;  %p526_p13 = pneg %p525_p9 }
  0x33   : > { %v304_v5 = vunpack.c.l.s4 %v576_v4 }
  0x34   : > { %227 = vadd.xlane.f32.xlu0 %v226_v6  ;;  %p531_p4 = pnand %p530_p3, %p526_p13 }
  0x38   : > { %v232_v7 = vld.sshfl [vmem:[#allocation1] sm:$0xff pattern:$0x75316420]  ;;  %v233_v8 = vld.sshfl [vmem:[#allocation1 + $0x8] sm:$0xff pattern:$0x75316420] }
  0x39   : > { %v236_v9 = vsel %vm223_vm0, %v232_v7, 0.0  ;;  %v237_v10 = vsel %vm223_vm0, %v233_v8, 0.0  ;;  %v305_v7 = vunpack.c.0.s8 %v304_v5 }
  0x3a   : > { %v238_v11 = vadd.f32 %v237_v10, %v236_v9 }
  0x3c   : > { %239 = vadd.xlane.f32.xlu0 %v238_v11 }
  0xa7   : > { %v228_v12 = vpop.xlane.xlu0 %227 }
  0xa8   : > { %v257_v13 = vsel %vm223_vm0, %v228_v12, 0.0  ;;  %v241_v15 = vmul.f32 0.00390625, %v228_v12 }
  0xa9   : > { %v258_v14 = vrot.slane %v257_v13, 4 }
  0xaa   : > { %v242_v19 = vmul.f32 %v241_v15, %v228_v12 }
  0xab   : > { %v259_v16 = vadd.f32 %v258_v14, %v257_v13 }
  0xad   : > { %v260_v17 = vrot.slane %v259_v16, 2 }
  0xaf   : > { %v261_v20 = vadd.f32 %v260_v17, %v259_v16  ;;  %v240_v21 = vpop.xlane.xlu0 %239 }
  0xb0   : > { %v243_v22 = vsub.f32 %v240_v21, %v242_v19  ;;  %v264_v23 = vsel %vm223_vm0, %v240_v21, 0.0 }
  0xb1   : > { %v262_v24 = vrot.slane %v261_v20, 1  ;;  %v265_v25 = vrot.slane %v264_v23, 4 }
  0xb2   : > { %v244_v26 = vmax.f32 %v243_v22, 0.0 }
  0xb3   : > { %v263_v27 = vadd.f32 %v262_v24, %v261_v20  ;;  %v266_v28 = vadd.f32 %v265_v25, %v264_v23 }
  0xb4   : > { %v245_v29 = vmul.f32 0.003921569, %v244_v26 }
  0xb5   : > { %v267_v30 = vrot.slane %v266_v28, 2  ;;  %v271_v32 = vmul.f32 0.0009765625, %v263_v27 }
  0xb6   : > { %v246_v31 = vadd.f32 1e-05, %v245_v29 }
  0xb7   : > { %v268_v33 = vadd.f32 %v267_v30, %v266_v28  ;;  %v272_v35 = vmul.f32 %v271_v32, %v263_v27 }
  0xb8   : > { %473 = vrsqrt.f32 %v246_v31  ;;  %vm253_vm2 = vweird.f32 %v246_v31 }
  0xb9   : > { %v269_v34 = vrot.slane %v268_v33, 1 }
  0xbb   : > { %v270_v36 = vadd.f32 %v269_v34, %v268_v33 }
  0xbd   : > { %v273_v37 = vsub.f32 %v270_v36, %v272_v35 }
  0xbe   : > { %v474_v38 = vpop.eup %473 }
  0xbf   : > { %v274_v39 = vmax.f32 %v273_v37, 0.0  ;;  %v248_v40 = vmul.f32 %v474_v38, %v246_v31  ;;  %vm254_vm1 = vweird.f32 %v474_v38 }
  0xc0   : > { %vm255_vm4 = vmor %vm253_vm2, %vm254_vm1 }
  0xc1   : > { %v275_v41 = vmul.f32 0.0009775171, %v274_v39  ;;  %v249_v43 = vmul.f32 %v474_v38, %v248_v40 }
  0xc3   : > { %v276_v42 = vadd.f32 1e-05, %v275_v41  ;;  %v250_v44 = vmul.f32 0.5, %v249_v43 }
  0xc5   : > { %475 = vrsqrt.f32 %v276_v42  ;;  %v251_v46 = vsub.f32 1.5, %v250_v44  ;;  %vm283_vm5 = vweird.f32 %v276_v42 }
  0xc7   : > { %v252_v49 = vmul.f32 %v474_v38, %v251_v46 }
  0xc9   : > { %v256_v52 = vsel %vm255_vm4, %v474_v38, %v252_v49 }
  0xca   : > { %v290_v57 = vmul.f32 %v287_v54, %v256_v52  ;;  %v293_v59 = vmul.f32 %v256_v52, %v241_v15 }
  0xcb   : > { %v476_v45 = vpop.eup %475 }
  0xcc   : > { %v278_v47 = vmul.f32 %v476_v45, %v276_v42  ;;  %vm284_vm3 = vweird.f32 %v476_v45  ;;  %v294_v63 = vmul.f32 %v293_v59, %v287_v54 }
  0xcd   : > { %vm285_vm6 = vmor %vm283_vm5, %vm284_vm3 }
  0xce   : > { %v279_v48 = vmul.f32 %v476_v45, %v278_v47 }
  0xd0   : > { %v280_v50 = vmul.f32 0.5, %v279_v48 }
  0xd2   : > { %v281_v51 = vsub.f32 1.5, %v280_v50 }
  0xd4   : > { %v282_v53 = vmul.f32 %v476_v45, %v281_v51 }
  0xd6   : > { %v286_v56 = vsel %vm285_vm6, %v476_v45, %v282_v53 }
  0xd7   : > { %v291_v58 = vmul.f32 %v288_v55, %v286_v56  ;;  %v295_v60 = vmul.f32 %v286_v56, %v271_v32 }
  0xd9   : > { %v292_v61 = vadd.f32 %v291_v58, %v290_v57  ;;  %v296_v62 = vmul.f32 %v295_v60, %v288_v55 }
  0xdb   : > { %301 = vperm.xlu1 %471, %v292_v61   ;;  %v297_v1 = vadd.f32 %v296_v62, %v294_v63 }
  0xdd   : > { %v298_v3 = vsub.f32 %v289_v2, %v297_v1 }
  0xe3   : > { %311 = vperm.xlu1 %471, %v298_v3  }
 0x14d   : > { %v302_v6 = vpop.permute.xlu1 %301 }
 0x14e   : > { %v306_v8 = vperm.slane %v302_v6, %v305_v7 }
 0x150   : > { %v308_v10 = vmul.f32 %v306_v8, %v698_v0 }
 0x155   : > { %v312_v9 = vpop.permute.xlu1 %311 }
 0x156   : > { %v316_v11 = vperm.slane %v312_v9, %v305_v7 }
 0x158   : > { %v318_v12 = vadd.f32 %v316_v11, %v308_v10 }
 0x15a   : > { %319 = vst [vmem:[%s215_s25] sm:$0xff] %v318_v12 }
 0x15b   : > { %534 = shalt.err (!%p531_p4)
}
 0x15c   : > { %425 = dma.vmem_to_hbm [thread:$0]  (%p652_p11), %s335_s30, 128, %s337_s5, %s321_s7  }
 0x15d PF: > { %s348_s29 = sand.u32 1, %s561_s15   ;;  %p764_p7 = scmp.ge.s32.totalorder %s573_s18, 2 }
 0x15e   : > { %s349_s12 = scalar_lea.sflag [#allocation4], %s348_s29 }
 0x15f   : > { %p432_p5 = pnand %p764_p7, %p656_p12 }
 0x161   : > { %p433_p8 = pneg %p432_p5 }
 0x163   : > { %556 = dma.done.wait (%p433_p8), %s349_s12, 128  }
 0x164   : > { %558 = vsyncadd (%p433_p8), %s349_s12, 4294967168  ;;  %p17_p10 = scmp.ge.s32.totalorder %s627_s21, 4   ;;  %s765_s15 = smov %s565_s16 }
 0x165   : > { %s766_s16 = smov %s569_s17  ;;  %s767_s17 = smov %s639_s24 }
 0x166   : > { %s768_s18 = smov %s627_s21  ;;  %19 = sbr.rel (!%p17_p10) target bundleno = 5 (0x5), region = 81 }
 0x16b   :  { %355 = vsyncpa [#allocation3], 1 }
 0x16c   :  { %357 = vsyncpa [#allocation3 + $0x1], 1 }
 0x16d   :  { %358 = vsyncpa [#allocation4], 1 }
 0x16e   :  { %360 = vsyncpa [#allocation4 + $0x1], 1 }

</bundles_post_ra>
